<compile_context>
chip_gen: v5e
topology: v5e:2x2
jax: 0.10.0
libtpu: 0.0.40
codegen_flags: <defaults>
</compile_context>

<pallas_src>
import jax
import jax.numpy as jnp
from jax.experimental import pallas as pl
from jax.experimental.pallas import tpu as pltpu


MAX_BATCH_TILE = 512  # sweep 256 / 512 / 1024 for your production batch sizes


def _round_up(x, m):
    return (x + m - 1) // m * m


def default_epilogue_dtype():
    """bf16 epilogues on chips with a bf16 VPU (v6e / v7x); f32 on older chips."""
    try:
        kind = jax.devices()[0].device_kind.lower()
    except Exception:
        return jnp.float32
    if any(tag in kind for tag in ("v2", "v3", "v4", "v5")):
        return jnp.float32
    return jnp.bfloat16


def make_decoder_kernel(out_dim, epi_dtype):
    """Builds the kernel for one batch tile of the full decoder MLP.

    z bf16, weights bf16, MXU accumulation f32, elementwise epilogues in
    `epi_dtype` (bf16 on v6e/v7x, f32 on v5e).  Output columns [0:D) = mu,
    [D:2D) = std = exp(log_var / 2).
    """

    def decoder_kernel(z_ref,
                       w1_ref, b1_ref,
                       w2_ref, b2_ref,
                       wh_ref, bh_ref,
                       out_ref):
        z = z_ref[...]

        # decoder[0]: Linear(latent -> 128) + LeakyReLU(0.2)
        h1 = jnp.dot(z, w1_ref[...], preferred_element_type=jnp.float32)
        h1 = h1.astype(epi_dtype) + b1_ref[...]
        h1 = jnp.maximum(h1, 0.2 * h1)

        # decoder[2]: Linear(128 -> dec_out_dim) + LeakyReLU(0.2)
        h2 = jnp.dot(h1.astype(jnp.bfloat16), w2_ref[...],
                     preferred_element_type=jnp.float32)
        h2 = h2.astype(epi_dtype) + b2_ref[...]
        h2 = jnp.maximum(h2, 0.2 * h2)

        # fused heads: one [TB, dec_out] @ [dec_out, 2*out_dim] matmul (f32 epilogue)
        heads = jnp.dot(h2.astype(jnp.bfloat16), wh_ref[...],
                        preferred_element_type=jnp.float32) + bh_ref[...]

        col = jax.lax.broadcasted_iota(jnp.int32, heads.shape, 1)
        is_mu = col < out_dim
        # exp only ever sees 0.5*log_var (mu columns evaluate exp(0) = 1), so no
        # spurious inf for large mu; selection then keeps mu / std per column.
        std = jnp.exp(jnp.where(is_mu, 0.0, 0.5 * heads))
        out_ref[...] = jnp.where(is_mu, heads, std).astype(out_ref.dtype)

    return decoder_kernel


def prepare_decoder_params(params, epilogue_dtype=jnp.float32):
    """One-time parameter prep (do at init / after each weight update, NOT per call).

    Fuses fc_mu / fc_log_var into one lane-wider head and casts all matmul
    operands to bf16 (biases to the epilogue dtype).
    """
    w_heads = jnp.concatenate([params["w_mu"], params["w_lv"]], axis=1)
    b_heads = jnp.concatenate([params["b_mu"], params["b_lv"]], axis=1)
    return dict(
        w1=params["w1"].astype(jnp.bfloat16),
        b1=params["b1"].astype(epilogue_dtype),
        w2=params["w2"].astype(jnp.bfloat16),
        b2=params["b2"].astype(epilogue_dtype),
        wh=w_heads.astype(jnp.bfloat16),
        bh=b_heads.astype(jnp.float32),
    )


def decoder_forward(z, prepped, *, max_tile=MAX_BATCH_TILE):
    """z: [B, latent_dim] float32. Returns (mu, std), each [B, out_dim] float32."""
    B, latent = z.shape
    w1, b1 = prepped["w1"], prepped["b1"]
    w2, b2 = prepped["w2"], prepped["b2"]
    wh, bh = prepped["wh"], prepped["bh"]
    hidden1 = w1.shape[1]
    dec_out = w2.shape[1]
    two_d = wh.shape[1]
    out_dim = two_d // 2
    epi_dtype = b1.dtype

    # bf16 packs 16 rows per vreg -> pad/tile the batch in multiples of 16.
    Bp = _round_up(B, 16)
    tb = min(max_tile, Bp)
    # Keep >= 2 grid steps when the batch allows it, so the "parallel" axis can
    # be sharded across both TensorCores on v7x.
    if Bp >= 32 and Bp // tb < 2:
        tb = _round_up(pl.cdiv(Bp, 2), 16)
    Bp = _round_up(Bp, tb)

    zb = z.astype(jnp.bfloat16)
    if Bp != B:
        zb = jnp.pad(zb, ((0, Bp - B), (0, 0)))

    grid = (Bp // tb,)

    def resident(shape):
        # Same block every grid step -> weights/biases stay resident in VMEM.
        return pl.BlockSpec(shape, lambda i: (0, 0))

    flops = 2 * Bp * (latent * hidden1 + hidden1 * dec_out + dec_out * two_d)
    bytes_accessed = (
        zb.size * 2 + w1.size * 2 + w2.size * 2 + wh.size * 2
        + b1.size * b1.dtype.itemsize + b2.size * b2.dtype.itemsize
        + bh.size * 4 + Bp * two_d * 4
    )

    fused = pl.pallas_call(
        make_decoder_kernel(out_dim, epi_dtype),
        out_shape=jax.ShapeDtypeStruct((Bp, two_d), jnp.float32),
        grid=grid,
        in_specs=[
            pl.BlockSpec((tb, latent), lambda i: (i, 0)),   # z: tiled over batch
            resident((latent, hidden1)),                    # w1
            resident((1, hidden1)),                         # b1
            resident((hidden1, dec_out)),                   # w2
            resident((1, dec_out)),                         # b2
            resident((dec_out, two_d)),                     # fused head weight
            resident((1, two_d)),                           # fused head bias
        ],
        out_specs=pl.BlockSpec((tb, two_d), lambda i: (i, 0)),
        compiler_params=pltpu.CompilerParams(
            dimension_semantics=("parallel",),              # shard batch over TCs (v7x)
            vmem_limit_bytes=32 * 1024 * 1024,
        ),
        cost_estimate=pl.CostEstimate(
            flops=int(flops),
            transcendentals=int(Bp * two_d),
            bytes_accessed=int(bytes_accessed),
        ),
    )(zb, w1, b1, w2, b2, wh, bh)

    mu = fused[:B, :out_dim]
    std = fused[:B, out_dim:]
    return mu, std


def init_params(key, latent_dim=64, dec_out_dim=512, out_dim=2):
    """Deterministic synthetic init (PyTorch-style uniform fan-in scaling).

    Weights are stored as [in_features, out_features] (transposed vs. nn.Linear).
    """
    def linear(k, fan_in, fan_out):
        kw, kb = jax.random.split(k)
        bound = 1.0 / jnp.sqrt(fan_in)
        w = jax.random.uniform(kw, (fan_in, fan_out), jnp.float32, -bound, bound)
        b = jax.random.uniform(kb, (1, fan_out), jnp.float32, -bound, bound)
        return w, b

    k1, k2, k3, k4 = jax.random.split(key, 4)
    w1, b1 = linear(k1, latent_dim, 128)
    w2, b2 = linear(k2, 128, dec_out_dim)
    w_mu, b_mu = linear(k3, dec_out_dim, out_dim)
    w_lv, b_lv = linear(k4, dec_out_dim, out_dim)
    return dict(w1=w1, b1=b1, w2=w2, b2=b2,
                w_mu=w_mu, b_mu=b_mu, w_lv=w_lv, b_lv=b_lv)


def decoder_reference(z, p, epi_dtype):
    """Pure-JAX reference mirroring the PyTorch forward with the SAME mixed
    precision as the kernel (bf16 MXU operands, f32 accumulation, `epi_dtype`
    epilogues).  This validates kernel-vs-kernel math; parity with a true f32
    PyTorch forward carries an additional bf16 error bound (~1e-2 relative)."""
    bf = jnp.bfloat16
    h1 = jnp.dot(z.astype(bf), p["w1"].astype(bf),
                 preferred_element_type=jnp.float32)
    h1 = h1.astype(epi_dtype) + p["b1"].astype(epi_dtype)
    h1 = jnp.maximum(h1, 0.2 * h1)
    h2 = jnp.dot(h1.astype(bf), p["w2"].astype(bf),
                 preferred_element_type=jnp.float32)
    h2 = h2.astype(epi_dtype) + p["b2"].astype(epi_dtype)
    h2 = jnp.maximum(h2, 0.2 * h2)
    h2b = h2.astype(bf)
    mu = jnp.dot(h2b, p["w_mu"].astype(bf),
                 preferred_element_type=jnp.float32) + p["b_mu"]
    lv = jnp.dot(h2b, p["w_lv"].astype(bf),
                 preferred_element_type=jnp.float32) + p["b_lv"]
    return mu.astype(jnp.float32), jnp.exp(0.5 * lv).astype(jnp.float32)


if __name__ == "__main__":
    key = jax.random.PRNGKey(0)
    k_z, k_p = jax.random.split(key)

    B, latent_dim, dec_out_dim, out_dim = 8, 64, 512, 2
    z = jax.random.normal(k_z, (B, latent_dim), jnp.float32)
    params = init_params(k_p, latent_dim, dec_out_dim, out_dim)

    epi_dtype = default_epilogue_dtype()
    # Hoisted out of the forward path: head fusion + casts happen once here.
    prepped = prepare_decoder_params(params, epi_dtype)

    mu, std = decoder_forward(z, prepped)
    jax.block_until_ready((mu, std))

    mu_ref, std_ref = decoder_reference(z, params, epi_dtype)
    assert mu.shape == (B, out_dim) and std.shape == (B, out_dim)
    # bf16 epilogues round the bias-add to bf16, so allow 1 bf16-ulp of slack
    # in that configuration; the f32-epilogue path keeps the tight bound.
    tol = 2e-3 if epi_dtype == jnp.float32 else 2e-2
    assert jnp.allclose(mu, mu_ref, atol=tol, rtol=tol)
    assert jnp.allclose(std, std_ref, atol=tol, rtol=tol)
    assert bool(jnp.all(std > 0))

    print("KERNEL_OK")
</pallas_src>

<mosaic_0001>
module attributes {stable_mosaic.version = 11 : i64} {
  func.func @decoder_kernel(%arg0: i32, %arg1: memref<16x64xbf16, #tpu.memory_space<vmem>>, %arg2: memref<64x128xbf16, #tpu.memory_space<vmem>>, %arg3: memref<1x128xbf16, #tpu.memory_space<vmem>>, %arg4: memref<128x512xbf16, #tpu.memory_space<vmem>>, %arg5: memref<1x512xbf16, #tpu.memory_space<vmem>>, %arg6: memref<512x4xbf16, #tpu.memory_space<vmem>>, %arg7: memref<1x4xf32, #tpu.memory_space<vmem>>, %arg8: memref<16x4xf32, #tpu.memory_space<vmem>>) attributes {dimension_semantics = [#tpu.dimension_semantics<parallel>], iteration_bounds = array<i64: 1>, scalar_prefetch = 0 : i64, scratch_operands = 0 : i64, tpu.core_type = #tpu.core_type<tc>, window_params = [{transform_indices = @transform_0, window_bounds = array<i64: 16, 64>}, {pipeline_mode = #tpu.pipeline_mode<synchronous>, transform_indices = @transform_1, window_bounds = array<i64: 64, 128>}, {pipeline_mode = #tpu.pipeline_mode<synchronous>, transform_indices = @transform_2, window_bounds = array<i64: 1, 128>}, {pipeline_mode = #tpu.pipeline_mode<synchronous>, transform_indices = @transform_3, window_bounds = array<i64: 128, 512>}, {pipeline_mode = #tpu.pipeline_mode<synchronous>, transform_indices = @transform_4, window_bounds = array<i64: 1, 512>}, {pipeline_mode = #tpu.pipeline_mode<synchronous>, transform_indices = @transform_5, window_bounds = array<i64: 512, 4>}, {pipeline_mode = #tpu.pipeline_mode<synchronous>, transform_indices = @transform_6, window_bounds = array<i64: 1, 4>}, {transform_indices = @transform_7, window_bounds = array<i64: 16, 4>}]} {
    %c0 = arith.constant 0 : index
    %c0_0 = arith.constant 0 : index
    %0 = vector.load %arg1[%c0, %c0_0] : memref<16x64xbf16, #tpu.memory_space<vmem>>, vector<16x64xbf16>
    %c0_1 = arith.constant 0 : index
    %c0_2 = arith.constant 0 : index
    %1 = vector.load %arg2[%c0_1, %c0_2] : memref<64x128xbf16, #tpu.memory_space<vmem>>, vector<64x128xbf16>
    %cst = arith.constant dense<0.000000e+00> : vector<16x128xf32>
    %2 = tpu.matmul %0, %1, %cst {dimension_numbers = #tpu.dot_dimension_numbers<[1], [0], [0], [1], [0, 0, 1, 1], [], []>} : vector<16x64xbf16>, vector<64x128xbf16>, vector<16x128xf32> -> vector<16x128xf32>
    %3 = arith.truncf %2 : vector<16x128xf32> to vector<16x128xbf16>
    %c0_3 = arith.constant 0 : index
    %c0_4 = arith.constant 0 : index
    %4 = vector.load %arg3[%c0_3, %c0_4] : memref<1x128xbf16, #tpu.memory_space<vmem>>, vector<1x128xbf16>
    %5 = vector.broadcast %4 : vector<1x128xbf16> to vector<16x128xbf16>
    %6 = arith.addf %3, %5 : vector<16x128xbf16>
    %cst_5 = arith.constant 2.001950e-01 : bf16
    %7 = vector.broadcast %cst_5 : bf16 to vector<16x128xbf16>
    %8 = arith.mulf %7, %6 : vector<16x128xbf16>
    %9 = arith.maximumf %6, %8 : vector<16x128xbf16>
    %c0_6 = arith.constant 0 : index
    %c0_7 = arith.constant 0 : index
    %10 = vector.load %arg4[%c0_6, %c0_7] : memref<128x512xbf16, #tpu.memory_space<vmem>>, vector<128x512xbf16>
    %cst_8 = arith.constant dense<0.000000e+00> : vector<16x512xf32>
    %11 = tpu.matmul %9, %10, %cst_8 {dimension_numbers = #tpu.dot_dimension_numbers<[1], [0], [0], [1], [0, 0, 1, 1], [], []>} : vector<16x128xbf16>, vector<128x512xbf16>, vector<16x512xf32> -> vector<16x512xf32>
    %12 = arith.truncf %11 : vector<16x512xf32> to vector<16x512xbf16>
    %c0_9 = arith.constant 0 : index
    %c0_10 = arith.constant 0 : index
    %13 = vector.load %arg5[%c0_9, %c0_10] : memref<1x512xbf16, #tpu.memory_space<vmem>>, vector<1x512xbf16>
    %14 = vector.broadcast %13 : vector<1x512xbf16> to vector<16x512xbf16>
    %15 = arith.addf %12, %14 : vector<16x512xbf16>
    %cst_11 = arith.constant 2.001950e-01 : bf16
    %16 = vector.broadcast %cst_11 : bf16 to vector<16x512xbf16>
    %17 = arith.mulf %16, %15 : vector<16x512xbf16>
    %18 = arith.maximumf %15, %17 : vector<16x512xbf16>
    %c0_12 = arith.constant 0 : index
    %c0_13 = arith.constant 0 : index
    %19 = vector.load %arg6[%c0_12, %c0_13] : memref<512x4xbf16, #tpu.memory_space<vmem>>, vector<512x4xbf16>
    %cst_14 = arith.constant dense<0.000000e+00> : vector<16x4xf32>
    %20 = tpu.matmul %18, %19, %cst_14 {dimension_numbers = #tpu.dot_dimension_numbers<[1], [0], [0], [1], [0, 0, 1, 1], [], []>} : vector<16x512xbf16>, vector<512x4xbf16>, vector<16x4xf32> -> vector<16x4xf32>
    %c0_15 = arith.constant 0 : index
    %c0_16 = arith.constant 0 : index
    %21 = vector.load %arg7[%c0_15, %c0_16] : memref<1x4xf32, #tpu.memory_space<vmem>>, vector<1x4xf32>
    %22 = vector.broadcast %21 : vector<1x4xf32> to vector<16x4xf32>
    %23 = arith.addf %20, %22 : vector<16x4xf32>
    %24 = tpu.iota {dimensions = array<i32: 1>} : vector<16x4xi32>
    %c2_i32 = arith.constant 2 : i32
    %25 = vector.broadcast %c2_i32 : i32 to vector<16x4xi32>
    %26 = arith.cmpi slt, %24, %25 : vector<16x4xi32>
    %cst_17 = arith.constant 5.000000e-01 : f32
    %27 = vector.broadcast %cst_17 : f32 to vector<16x4xf32>
    %28 = arith.mulf %27, %23 : vector<16x4xf32>
    %cst_18 = arith.constant 0.000000e+00 : f32
    %29 = vector.broadcast %cst_18 : f32 to vector<16x4xf32>
    %30 = arith.select %26, %29, %28 : vector<16x4xi1>, vector<16x4xf32>
    %31 = math.exp %30 : vector<16x4xf32>
    %32 = arith.select %26, %23, %31 : vector<16x4xi1>, vector<16x4xf32>
    %c0_19 = arith.constant 0 : index
    %c0_20 = arith.constant 0 : index
    %33 = vector.load %arg8[%c0_19, %c0_20] : memref<16x4xf32, #tpu.memory_space<vmem>>, vector<16x4xf32>
    tpu.vector_store %arg8[%c0_19, %c0_20], %32 {strides = array<i32>} : memref<16x4xf32, #tpu.memory_space<vmem>>, vector<16x4xf32>,
    return
  }
  func.func @transform_0(%arg0: i32) -> (i32, i32) {
    %c0_i32 = arith.constant 0 : i32
    %c0_i32_0 = arith.constant 0 : i32
    return %arg0, %c0_i32 : i32, i32
  }
  func.func @transform_1(%arg0: i32) -> (i32, i32) {
    %c0_i32 = arith.constant 0 : i32
    %c0_i32_0 = arith.constant 0 : i32
    %c0_i32_1 = arith.constant 0 : i32
    return %c0_i32, %c0_i32_0 : i32, i32
  }
  func.func @transform_2(%arg0: i32) -> (i32, i32) {
    %c0_i32 = arith.constant 0 : i32
    %c0_i32_0 = arith.constant 0 : i32
    %c0_i32_1 = arith.constant 0 : i32
    return %c0_i32, %c0_i32_0 : i32, i32
  }
  func.func @transform_3(%arg0: i32) -> (i32, i32) {
    %c0_i32 = arith.constant 0 : i32
    %c0_i32_0 = arith.constant 0 : i32
    %c0_i32_1 = arith.constant 0 : i32
    return %c0_i32, %c0_i32_0 : i32, i32
  }
  func.func @transform_4(%arg0: i32) -> (i32, i32) {
    %c0_i32 = arith.constant 0 : i32
    %c0_i32_0 = arith.constant 0 : i32
    %c0_i32_1 = arith.constant 0 : i32
    return %c0_i32, %c0_i32_0 : i32, i32
  }
  func.func @transform_5(%arg0: i32) -> (i32, i32) {
    %c0_i32 = arith.constant 0 : i32
    %c0_i32_0 = arith.constant 0 : i32
    %c0_i32_1 = arith.constant 0 : i32
    return %c0_i32, %c0_i32_0 : i32, i32
  }
  func.func @transform_6(%arg0: i32) -> (i32, i32) {
    %c0_i32 = arith.constant 0 : i32
    %c0_i32_0 = arith.constant 0 : i32
    %c0_i32_1 = arith.constant 0 : i32
    return %c0_i32, %c0_i32_0 : i32, i32
  }
  func.func @transform_7(%arg0: i32) -> (i32, i32) {
    %c0_i32 = arith.constant 0 : i32
    %c0_i32_0 = arith.constant 0 : i32
    return %arg0, %c0_i32 : i32, i32
  }
}

</mosaic_0001>

<bundles_post_ra>
// kernel: tpu_custom_call.1
= control target key start
LH: loop header
LB: loop body
LE: loop exit
PB: predicated region body
PF: predicated region fallthrough
CT: control target
= control target key end

     0   :  { %12 = vsyncpa [#allocation3], 0  ;;  %s1576_s0 = inlined_call_operand.vmem [shape: bf16[16,64], index: 0, kind: input, shape index: {}]   ;;  %s1577_s1 = inlined_call_operand.hbm [shape: bf16[64,128], index: 1, kind: input, shape index: {}]   ;;  %s1578_s2 = inlined_call_operand.vmem [shape: bf16[1,128], index: 2, kind: input, shape index: {}]   ;;  %s1579_s3 = inlined_call_operand.vmem [shape: bf16[128,512], index: 3, kind: input, shape index: {}]   ;;  %s1580_s4 = inlined_call_operand.hbm [shape: bf16[1,512], index: 4, kind: input, shape index: {}]   ;;  %s1581_s5 = inlined_call_operand.vmem [shape: bf16[512,4], index: 5, kind: input, shape index: {}]   ;;  %s1582_s6 = inlined_call_operand.vmem [shape: f32[1,4], index: 6, kind: input, shape index: {}]   ;;  %s1583_s7 = inlined_call_operand.vmem [shape: f32[16,4], index: 7, kind: output, shape index: {}]  }
   0x1   :  { %s20_s26 = sshll.u32 %s1577_s1, 4  ;;  %s21_s26 = int_to_ptr.hbm [resolvable:$true] %s20_s26 }
   0x2   :  { %13 = vsyncpa [#allocation5], 0  ;;  %s1219_s27 = smov [#allocation2]   ;;  %s38_s8 = sshll.u32 %s1580_s4, 4  ;;  %s39_s8 = int_to_ptr.hbm [resolvable:$true] %s38_s8 }
   0x3   :  { %s22_s28 = sshll.u32 %s1219_s27, 4  ;;  %s1220_s9 = smov 64   ;;  %s23_s28 = int_to_ptr.vmem [resolvable:$true] %s22_s28 }
   0x4   :  { %s1221_s10 = smov 4   ;;  %s1222_s11 = smov [#allocation4]  }
   0x5   :  { %28 = dma.hbm_to_vmem [thread:$0]  %s21_s26, 512, %s23_s28, [#allocation3], %s1220_s9, %s1220_s9, %s1221_s10  }
   0x6   :  { %s40_s12 = sshll.u32 %s1222_s11, 4  ;;  %s41_s12 = int_to_ptr.vmem [resolvable:$true] %s40_s12 }
   0x7   :  { %43 = dma.hbm_to_vmem [thread:$0]  %s39_s8, 64, %s41_s12, [#allocation5]  }
   0x8   :  { %1215 = dma.done.wait [#allocation3], 512  }
   0x9   :  { %1216 = vsyncadd [#allocation3], 4294966784 }
   0xa   :  { %1217 = dma.done.wait [#allocation5], 64  }
   0xb   :  { %1218 = vsyncadd [#allocation5], 4294967232  ;;  %v1093_v0 = vld [vmem:[#allocation2 + $0x18] sm:$0xff]  ;;  %v1092_v1 = vld [vmem:[#allocation2 + $0x10] sm:$0xff]  ;;  %vm96_vm0 = vcmask 523264   ;;  %vm803_vm2 = vcmask 31744  }
   0xc   :  { %v947_v2 = vld [vmem:[%s1579_s3 + $0xe0] sm:$0xf]  ;;  %104 = vmatpush.bf16.msra.mxu0 %v1093_v0  ;;  %v1124_v3 = vld [vmem:[%s1579_s3 + $0xec] sm:$0xf0]  ;;  %v1122_v4 = vld [vmem:[%s1579_s3 + $0xe4] sm:$0xf] }
   0xd   :  { %v949_v5 = vld [vmem:[%s1579_s3 + $0xf0] sm:$0xf0]  ;;  %v948_v6 = vor.u32 %v1124_v3, %v947_v2  ;;  %v955_v8 = vld [vmem:[%s1579_s3 + $0xe8] sm:$0xf]  ;;  %v1125_v9 = vld [vmem:[%s1579_s3 + $0xf4] sm:$0xf0] }
   0xe   :  { %v952_v7 = vor.u32 %v1122_v4, %v949_v5  ;;  %v956_v10 = vor.u32 %v1125_v9, %v955_v8  ;;  %v931_v11 = vld [vmem:[%s1579_s3 + $0xc0] sm:$0xf]  ;;  %v1120_v12 = vld [vmem:[%s1579_s3 + $0xcc] sm:$0xf0]  ;;  %v1118_v14 = vld [vmem:[%s1579_s3 + $0xc4] sm:$0xf] }
   0xf   :  { %331 = vmatpush.bf16.msra.mxu1 %v948_v6  ;;  %v932_v13 = vor.u32 %v1120_v12, %v931_v11  ;;  %v933_v15 = vld [vmem:[%s1579_s3 + $0xd0] sm:$0xf0]  ;;  %v939_v16 = vld [vmem:[%s1579_s3 + $0xc8] sm:$0xf]  ;;  %v1121_v19 = vld [vmem:[%s1579_s3 + $0xd4] sm:$0xf0] }
  0x10   :  { %345 = vmatpush.bf16.msra.mxu2 %v952_v7  ;;  %105 = vmatpush.bf16.msra.mxu0 %v1092_v1  ;;  %v1091_v17 = vld [vmem:[#allocation2 + $0x8] sm:$0xff]  ;;  %v936_v18 = vor.u32 %v1118_v14, %v933_v15  ;;  %v940_v20 = vor.u32 %v1121_v19, %v939_v16  ;;  %v1123_v21 = vld [vmem:[%s1579_s3 + $0xec] sm:$0xf]  ;;  %v957_v22 = vld [vmem:[%s1579_s3 + $0xf8] sm:$0xf0] }
  0x11   :  { %359 = vmatpush.bf16.msra.mxu3 %v956_v10  ;;  %v1090_v23 = vld [vmem:[#allocation2] sm:$0xff]  ;;  %v960_v24 = vor.u32 %v1123_v21, %v957_v22  ;;  %v941_v26 = vld [vmem:[%s1579_s3 + $0xd8] sm:$0xf0]  ;;  %v1089_v27 = vld [vmem:[%s1576_s0] sm:$0xff] }
  0x12   :  { %v1119_v25 = vld [vmem:[%s1579_s3 + $0xcc] sm:$0xf]  ;;  %v915_v29 = vld [vmem:[%s1579_s3 + $0xa0] sm:$0xf]  ;;  %v1116_v30 = vld [vmem:[%s1579_s3 + $0xac] sm:$0xf0] }
  0x13   :  { %332 = vmatpush.bf16.msra.mxu1 %v932_v13  ;;  %v944_v28 = vor.u32 %v1119_v25, %v941_v26  ;;  %v1114_v31 = vld [vmem:[%s1579_s3 + $0xa4] sm:$0xf]  ;;  %v916_v32 = vor.u32 %v1116_v30, %v915_v29  ;;  %v917_v33 = vld [vmem:[%s1579_s3 + $0xb0] sm:$0xf0]  ;;  %v923_v34 = vld [vmem:[%s1579_s3 + $0xa8] sm:$0xf] }
  0x14   :  { %346 = vmatpush.bf16.msra.mxu2 %v936_v18  ;;  %106 = vmatpush.bf16.msra.mxu0 %v1091_v17  ;;  %v1117_v35 = vld [vmem:[%s1579_s3 + $0xb4] sm:$0xf0]  ;;  %v920_v36 = vor.u32 %v1114_v31, %v917_v33  ;;  %v1115_v38 = vld [vmem:[%s1579_s3 + $0xac] sm:$0xf]  ;;  %v925_v39 = vld [vmem:[%s1579_s3 + $0xb8] sm:$0xf0] }
  0x15   :  { %360 = vmatpush.bf16.msra.mxu3 %v940_v20  ;;  %v924_v37 = vor.u32 %v1117_v35, %v923_v34  ;;  %v928_v40 = vor.u32 %v1115_v38, %v925_v39  ;;  %v899_v41 = vld [vmem:[%s1579_s3 + $0x80] sm:$0xf]  ;;  %v1112_v42 = vld [vmem:[%s1579_s3 + $0x8c] sm:$0xf0]  ;;  %v1110_v43 = vld [vmem:[%s1579_s3 + $0x84] sm:$0xf] }
  0x16   :  { %v900_v44 = vor.u32 %v1112_v42, %v899_v41  ;;  %v901_v45 = vld [vmem:[%s1579_s3 + $0x90] sm:$0xf0]  ;;  %v907_v46 = vld [vmem:[%s1579_s3 + $0x88] sm:$0xf]  ;;  %v1113_v47 = vld [vmem:[%s1579_s3 + $0x94] sm:$0xf0] }
  0x17   :  { %333 = vmatpush.bf16.msra.mxu1 %v916_v32  ;;  %v904_v48 = vor.u32 %v1110_v43, %v901_v45  ;;  %v908_v49 = vor.u32 %v1113_v47, %v907_v46  ;;  %v1111_v50 = vld [vmem:[%s1579_s3 + $0x8c] sm:$0xf]  ;;  %v909_v51 = vld [vmem:[%s1579_s3 + $0x98] sm:$0xf0]  ;;  %v883_v53 = vld [vmem:[%s1579_s3 + $0x60] sm:$0xf] }
  0x18   :  { %107 = vmatpush.bf16.msra.mxu0 %v1090_v23  ;;  %347 = vmatpush.bf16.msra.mxu2 %v920_v36  ;;  %v912_v52 = vor.u32 %v1111_v50, %v909_v51  ;;  %v1108_v54 = vld [vmem:[%s1579_s3 + $0x6c] sm:$0xf0]  ;;  %v1106_v55 = vld [vmem:[%s1579_s3 + $0x64] sm:$0xf]  ;;  %v885_v57 = vld [vmem:[%s1579_s3 + $0x70] sm:$0xf0] }
  0x19   :  { %361 = vmatpush.bf16.msra.mxu3 %v924_v37  ;;  %v884_v56 = vor.u32 %v1108_v54, %v883_v53  ;;  %v891_v58 = vld [vmem:[%s1579_s3 + $0x68] sm:$0xf]  ;;  %v1109_v59 = vld [vmem:[%s1579_s3 + $0x74] sm:$0xf0]  ;;  %v888_v60 = vor.u32 %v1106_v55, %v885_v57  ;;  %v1107_v62 = vld [vmem:[%s1579_s3 + $0x6c] sm:$0xf] }
  0x1a   :  { %v892_v61 = vor.u32 %v1109_v59, %v891_v58  ;;  %v893_v63 = vld [vmem:[%s1579_s3 + $0x78] sm:$0xf0]  ;;  %v867_v1 = vld [vmem:[%s1579_s3 + $0x40] sm:$0xf]  ;;  %v1104_v2 = vld [vmem:[%s1579_s3 + $0x4c] sm:$0xf0] }
  0x1b   :  { %832 = vmatmul.msk.bf16.vlgmr.msra.gmra.mxu0 %vm96_vm0, %v1089_v27  ;;  %334 = vmatpush.bf16.msra.mxu1 %v900_v44  ;;  %v896_v0 = vor.u32 %v1107_v62, %v893_v63  ;;  %v1102_v3 = vld [vmem:[%s1579_s3 + $0x44] sm:$0xf]  ;;  %v868_v4 = vor.u32 %v1104_v2, %v867_v1  ;;  %v869_v5 = vld [vmem:[%s1579_s3 + $0x50] sm:$0xf0]  ;;  %v875_v6 = vld [vmem:[%s1579_s3 + $0x48] sm:$0xf] }
  0x1c   :  { %373 = vmatpush.bf16.msrb.mxu0 %v960_v24  ;;  %348 = vmatpush.bf16.msra.mxu2 %v904_v48  ;;  %v1105_v7 = vld [vmem:[%s1579_s3 + $0x54] sm:$0xf0]  ;;  %v872_v8 = vor.u32 %v1102_v3, %v869_v5  ;;  %v1103_v10 = vld [vmem:[%s1579_s3 + $0x4c] sm:$0xf]  ;;  %v877_v11 = vld [vmem:[%s1579_s3 + $0x58] sm:$0xf0] }
  0x1d   :  { %362 = vmatpush.bf16.msra.mxu3 %v908_v49  ;;  %v876_v9 = vor.u32 %v1105_v7, %v875_v6  ;;  %v880_v12 = vor.u32 %v1103_v10, %v877_v11  ;;  %v851_v13 = vld [vmem:[%s1579_s3 + $0x20] sm:$0xf]  ;;  %v1100_v14 = vld [vmem:[%s1579_s3 + $0x2c] sm:$0xf0]  ;;  %v1098_v15 = vld [vmem:[%s1579_s3 + $0x24] sm:$0xf] }
  0x1e   :  { %v852_v16 = vor.u32 %v1100_v14, %v851_v13  ;;  %v853_v17 = vld [vmem:[%s1579_s3 + $0x30] sm:$0xf0]  ;;  %v859_v18 = vld [vmem:[%s1579_s3 + $0x28] sm:$0xf]  ;;  %v1101_v19 = vld [vmem:[%s1579_s3 + $0x34] sm:$0xf0] }
  0x1f   :  { %335 = vmatpush.bf16.msra.mxu1 %v884_v56  ;;  %v856_v20 = vor.u32 %v1098_v15, %v853_v17  ;;  %v860_v21 = vor.u32 %v1101_v19, %v859_v18  ;;  %v1099_v22 = vld [vmem:[%s1579_s3 + $0x2c] sm:$0xf]  ;;  %v861_v23 = vld [vmem:[%s1579_s3 + $0x38] sm:$0xf0]  ;;  %v835_v25 = vld [vmem:[%s1579_s3] sm:$0xf] }
  0x20   :  { %374 = vmatpush.bf16.msrb.mxu0 %v944_v28  ;;  %349 = vmatpush.bf16.msra.mxu2 %v888_v60  ;;  %v864_v24 = vor.u32 %v1099_v22, %v861_v23  ;;  %v1096_v26 = vld [vmem:[%s1579_s3 + $0xc] sm:$0xf0]  ;;  %v1094_v27 = vld [vmem:[%s1579_s3 + $0x4] sm:$0xf]  ;;  %v837_v29 = vld [vmem:[%s1579_s3 + $0x10] sm:$0xf0] }
  0x21   :  { %363 = vmatpush.bf16.msra.mxu3 %v892_v61  ;;  %v836_v28 = vor.u32 %v1096_v26, %v835_v25  ;;  %v843_v30 = vld [vmem:[%s1579_s3 + $0x8] sm:$0xf]  ;;  %v1097_v31 = vld [vmem:[%s1579_s3 + $0x14] sm:$0xf0]  ;;  %v840_v32 = vor.u32 %v1094_v27, %v837_v29  ;;  %v1095_v34 = vld [vmem:[%s1579_s3 + $0xc] sm:$0xf] }
  0x22   :  { %v844_v33 = vor.u32 %v1097_v31, %v843_v30  ;;  %v845_v35 = vld [vmem:[%s1579_s3 + $0x18] sm:$0xf0]  ;;  %v116_v36 = vld [vmem:[%s1578_s2] sm:$0x1]  ;;  %v391_v58 = vld [vmem:[#allocation4] sm:$0xf] }
  0x23   :  { %336 = vmatpush.bf16.msra.mxu1 %v868_v4  ;;  %v848_v37 = vor.u32 %v1095_v34, %v845_v35  ;;  %v118_v38 = vpack.i.b16 %v116_v36, %v116_v36  ;;  %393 = vst [vmem:[#allocation1] ss:$9 sm:$0xff] %v391_v58  ;;  %v1133_v59 = vld [vmem:[%s1581_s5 + $0x38] sm:$0xff]  ;;  %v1132_v63 = vld [vmem:[%s1581_s5 + $0x30] sm:$0xff]  ;;  %v1131_v3 = vld [vmem:[%s1581_s5 + $0x28] sm:$0xff] }
  0x24   :  { %375 = vmatpush.bf16.msrb.mxu0 %v928_v40  ;;  %350 = vmatpush.bf16.msra.mxu2 %v872_v8  ;;  %v1141_v60 = vld [vmem:[%s1581_s5 + $0x78] sm:$0xff]  ;;  %v1148_v1 = vld [vmem:[%s1581_s5 + $0xb0] sm:$0xff]  ;;  %v1139_v4 = vld [vmem:[%s1581_s5 + $0x68] sm:$0xff] }
  0x25   :  { %364 = vmatpush.bf16.msra.mxu3 %v876_v9  ;;  %v120_v39 = vperm.slane %v118_v38, 0  ;;  %v1149_v61 = vld [vmem:[%s1581_s5 + $0xb8] sm:$0xff]  ;;  %v1156_v2 = vld [vmem:[%s1581_s5 + $0xf0] sm:$0xff]  ;;  %v1147_v5 = vld [vmem:[%s1581_s5 + $0xa8] sm:$0xff] }
  0x26   :  { %v1157_v62 = vld [vmem:[%s1581_s5 + $0xf8] sm:$0xff]  ;;  %v1155_v6 = vld [vmem:[%s1581_s5 + $0xe8] sm:$0xff]  ;;  %v1130_v7 = vld [vmem:[%s1581_s5 + $0x20] sm:$0xff] }
  0x27   :  { %337 = vmatpush.bf16.msra.mxu1 %v852_v16  ;;  %v123_v42 = vunpack.c.l.bf16 %v120_v39  ;;  %v1138_v8 = vld [vmem:[%s1581_s5 + $0x60] sm:$0xff]  ;;  %v1129_v11 = vld [vmem:[%s1581_s5 + $0x18] sm:$0xff]  ;;  %v1128_v15 = vld [vmem:[%s1581_s5 + $0x10] sm:$0xff] }
  0x28   :  { %376 = vmatpush.bf16.msrb.mxu0 %v912_v52  ;;  %351 = vmatpush.bf16.msra.mxu2 %v856_v20  ;;  %v1146_v9 = vld [vmem:[%s1581_s5 + $0xa0] sm:$0xff]  ;;  %v1145_v13 = vld [vmem:[%s1581_s5 + $0x98] sm:$0xff]  ;;  %v1136_v16 = vld [vmem:[%s1581_s5 + $0x50] sm:$0xff] }
  0x29   :  { %365 = vmatpush.bf16.msra.mxu3 %v860_v21  ;;  %v1154_v10 = vld [vmem:[%s1581_s5 + $0xe0] sm:$0xff]  ;;  %v1153_v14 = vld [vmem:[%s1581_s5 + $0xd8] sm:$0xff]  ;;  %v1144_v17 = vld [vmem:[%s1581_s5 + $0x90] sm:$0xff] }
  0x2a   :  { %v1152_v18 = vld [vmem:[%s1581_s5 + $0xd0] sm:$0xff]  ;;  %v1127_v19 = vld [vmem:[%s1581_s5 + $0x8] sm:$0xff]  ;;  %v1126_v23 = vld [vmem:[%s1581_s5] sm:$0xff] }
  0x2b   :  { %338 = vmatpush.bf16.msra.mxu1 %v836_v28  ;;  %v1135_v20 = vld [vmem:[%s1581_s5 + $0x48] sm:$0xff]  ;;  %v1142_v25 = vld [vmem:[%s1581_s5 + $0x80] sm:$0xff]  ;;  %v396_v29 = vld [vmem:[#allocation1 + $0x12] sm:$0xff] }
  0x2c   :  { %377 = vmatpush.bf16.msrb.mxu0 %v896_v0  ;;  %352 = vmatpush.bf16.msra.mxu2 %v840_v32  ;;  %v1140_v0 = vld [vmem:[%s1581_s5 + $0x70] sm:$0xff]  ;;  %v1143_v21 = vld [vmem:[%s1581_s5 + $0x88] sm:$0xff]  ;;  %v1150_v26 = vld [vmem:[%s1581_s5 + $0xc0] sm:$0xff] }
  0x2d   :  { %366 = vmatpush.bf16.msra.mxu3 %v844_v33  ;;  %v1151_v22 = vld [vmem:[%s1581_s5 + $0xc8] sm:$0xff]  ;;  %v394_v27 = vld [vmem:[#allocation1] sm:$0xff]  ;;  %v404_v33 = vpack.i.b16 %v396_v29, %v396_v29 }
  0x2e   :  { %v395_v28 = vld [vmem:[#allocation1 + $0x9] sm:$0xff]  ;;  %v397_v30 = vld [vmem:[#allocation1 + $0x1b] sm:$0xff]  ;;  %v398_v31 = vpack.i.b16 %v394_v27, %v394_v27 }
  0x2f   :  { %734 = vmatpush.bf16.msrb.mxu1 %v1133_v59  ;;  %v401_v32 = vpack.i.b16 %v395_v28, %v395_v28  ;;  %v407_v34 = vpack.i.b16 %v397_v30, %v397_v30  ;;  %v406_v38 = vperm.slane %v404_v33, 0 }
  0x30   :  { %378 = vmatpush.bf16.msrb.mxu0 %v880_v12  ;;  %748 = vmatpush.bf16.msrb.mxu2 %v1141_v60  ;;  %v1137_v12 = vld [vmem:[%s1581_s5 + $0x58] sm:$0xff]  ;;  %v400_v35 = vperm.slane %v398_v31, 0 }
  0x31   :  { %762 = vmatpush.bf16.msrb.mxu3 %v1149_v61  ;;  %v403_v36 = vperm.slane %v401_v32, 0  ;;  %v409_v39 = vperm.slane %v407_v34, 0 }
  0x33   :  { %735 = vmatpush.bf16.msrb.mxu1 %v1132_v63 }
  0x34   :  { %379 = vmatpush.bf16.msrb.mxu0 %v864_v24  ;;  %749 = vmatpush.bf16.msrb.mxu2 %v1140_v0  ;;  %v1134_v24 = vld [vmem:[%s1581_s5 + $0x40] sm:$0xff] }
  0x35   :  { %763 = vmatpush.bf16.msrb.mxu3 %v1148_v1 }
  0x37   :  { %736 = vmatpush.bf16.msrb.mxu1 %v1131_v3 }
  0x38   :  { %380 = vmatpush.bf16.msrb.mxu0 %v848_v37  ;;  %750 = vmatpush.bf16.msrb.mxu2 %v1139_v4 }
  0x39   :  { %764 = vmatpush.bf16.msrb.mxu3 %v1147_v5 }
  0x3b   :  { %737 = vmatpush.bf16.msrb.mxu1 %v1130_v7 }
  0x3c   :  { %776 = vmatpush.bf16.msra.mxu0 %v1157_v62  ;;  %751 = vmatpush.bf16.msrb.mxu2 %v1138_v8 }
  0x3d   :  { %765 = vmatpush.bf16.msrb.mxu3 %v1146_v9 }
  0x3f   :  { %738 = vmatpush.bf16.msrb.mxu1 %v1129_v11 }
  0x40   :  { %777 = vmatpush.bf16.msra.mxu0 %v1156_v2  ;;  %752 = vmatpush.bf16.msrb.mxu2 %v1137_v12 }
  0x41   :  { %766 = vmatpush.bf16.msrb.mxu3 %v1145_v13 }
  0x43   :  { %739 = vmatpush.bf16.msrb.mxu1 %v1128_v15 }
  0x44   :  { %778 = vmatpush.bf16.msra.mxu0 %v1155_v6  ;;  %753 = vmatpush.bf16.msrb.mxu2 %v1136_v16 }
  0x45   :  { %767 = vmatpush.bf16.msrb.mxu3 %v1144_v17 }
  0x47   :  { %740 = vmatpush.bf16.msrb.mxu1 %v1127_v19 }
  0x48   :  { %779 = vmatpush.bf16.msra.mxu0 %v1154_v10  ;;  %754 = vmatpush.bf16.msrb.mxu2 %v1135_v20 }
  0x49   :  { %768 = vmatpush.bf16.msrb.mxu3 %v1143_v21 }
  0x4b   :  { %741 = vmatpush.bf16.msrb.mxu1 %v1126_v23 }
  0x4c   :  { %780 = vmatpush.bf16.msra.mxu0 %v1153_v14  ;;  %755 = vmatpush.bf16.msrb.mxu2 %v1134_v24 }
  0x4d   :  { %769 = vmatpush.bf16.msrb.mxu3 %v1142_v25 }
  0x50   :  { %781 = vmatpush.bf16.msra.mxu0 %v1152_v18 }
  0x54   :  { %782 = vmatpush.bf16.msra.mxu0 %v1151_v22 }
  0x58   :  { %783 = vmatpush.bf16.msra.mxu0 %v1150_v26 }
  0x98   :  { %v109_v40 = vpop.f32.mrf.mxu0 }
  0x99   :  { %v114_v41 = vpack.c.bf16 %v109_v40, %v109_v40 }
  0x9b   :  { %v121_v43 = vunpack.c.l.bf16 %v114_v41 }
  0x9d   :  { %v124_v44 = vadd.f32 %v123_v42, %v121_v43  ;;  %v418_v43 = vunpack.c.l.bf16 %v400_v35 }
  0x9f   :  { %v126_v46 = vpack.c.bf16 %v124_v44, %v124_v44  ;;  %v419_v44 = vunpack.c.l.bf16 %v403_v36 }
  0xa0   :  { %v111_v45 = vpop.f32.mrf.mxu0 }
  0xa1   :  { %v115_v47 = vpack.c.bf16 %v111_v45, %v111_v45  ;;  %v128_v49 = vunpack.c.l.bf16 %v126_v46 }
  0xa3   :  { %v122_v48 = vunpack.c.l.bf16 %v115_v47  ;;  %v130_v52 = vmul.f32 0.20019531, %v128_v49  ;;  %v420_v47 = vunpack.c.l.bf16 %v406_v38 }
  0xa5   :  { %v125_v50 = vadd.f32 %v123_v42, %v122_v48  ;;  %v136_v55 = vmax.f32 %v128_v49, %v130_v52  ;;  %v421_v48 = vunpack.c.l.bf16 %v409_v39 }
  0xa7   :  { %v127_v51 = vpack.c.bf16 %v125_v50, %v125_v50 }
  0xa9   :  { %v129_v53 = vunpack.c.l.bf16 %v127_v51 }
  0xab   :  { %v131_v54 = vmul.f32 0.20019531, %v129_v53 }
  0xad   :  { %v137_v56 = vmax.f32 %v129_v53, %v131_v54 }
  0xaf   :  { %v138_v57 = vpack.c.bf16 %v137_v56, %v136_v55 }
  0xb1   :  { %339 = vmatmul.bf16.vlgmr.msra.gmra.mxu1 %v138_v57  ;;  %353 = vmatmul.bf16.vlgmr.msra.gmra.mxu2 %v138_v57 }
  0xb2   :  { %367 = vmatmul.bf16.vlgmr.msra.gmra.mxu3 %v138_v57  ;;  %381 = vmatmul.bf16.vlgmr.msrb.gmra.mxu0 %v138_v57 }
 0x12e   :  { %v340_v37 = vpop.f32.mrf.mxu1 }
 0x12f   :  { %v382_v40 = vpop.f32.mrf.mxu0 }
 0x134   :  { %v354_v41 = vpop.f32.mrf.mxu2 }
 0x135   :  { %v387_v42 = vpack.c.bf16 %v354_v41, %v340_v37  ;;  %v368_v45 = vpop.f32.mrf.mxu3  ;;  %v790_v41 = vlaneseq }
 0x136   :  { %v388_v46 = vpack.c.bf16 %v382_v40, %v368_v45  ;;  %v342_v57 = vpop.f32.mrf.mxu1  ;;  %v1162_v40 = vld [vmem:[%s1582_s6] ss:$0 sm:$0xff] }
 0x137   :  { %v410_v49 = vunpack.c.l.bf16 %v387_v42  ;;  %v411_v50 = vunpack.c.h.bf16 %v387_v42  ;;  %v384_v60 = vpop.f32.mrf.mxu0 }
 0x138   :  { %v412_v51 = vunpack.c.l.bf16 %v388_v46  ;;  %v413_v52 = vunpack.c.h.bf16 %v388_v46 }
 0x139   :  { %v422_v53 = vadd.f32 %v418_v43, %v410_v49  ;;  %v423_v54 = vadd.f32 %v419_v44, %v411_v50 }
 0x13a   :  { %v424_v55 = vadd.f32 %v420_v47, %v412_v51  ;;  %v425_v56 = vadd.f32 %v421_v48, %v413_v52 }
 0x13b   :  { %v430_v59 = vpack.c.bf16 %v423_v54, %v422_v53 }
 0x13c   :  { %v356_v58 = vpop.f32.mrf.mxu2  ;;  %v431_v63 = vpack.c.bf16 %v425_v56, %v424_v55 }
 0x13d   :  { %v389_v61 = vpack.c.bf16 %v356_v58, %v342_v57  ;;  %v370_v62 = vpop.f32.mrf.mxu3  ;;  %v434_v7 = vunpack.c.l.bf16 %v430_v59  ;;  %v435_v8 = vunpack.c.h.bf16 %v430_v59 }
 0x13e   :  { %v390_v0 = vpack.c.bf16 %v384_v60, %v370_v62  ;;  %v437_v9 = vunpack.c.h.bf16 %v431_v63  ;;  %v436_v12 = vunpack.c.l.bf16 %v431_v63 }
 0x13f   :  { %v414_v1 = vunpack.c.l.bf16 %v389_v61  ;;  %v415_v2 = vunpack.c.h.bf16 %v389_v61  ;;  %v442_v16 = vmul.f32 0.20019531, %v434_v7  ;;  %v443_v18 = vmul.f32 0.20019531, %v435_v8 }
 0x140   :  { %v416_v3 = vunpack.c.l.bf16 %v390_v0  ;;  %v417_v4 = vunpack.c.h.bf16 %v390_v0  ;;  %v445_v19 = vmul.f32 0.20019531, %v437_v9  ;;  %v444_v22 = vmul.f32 0.20019531, %v436_v12 }
 0x141   :  { %v426_v5 = vadd.f32 %v418_v43, %v414_v1  ;;  %v427_v6 = vadd.f32 %v419_v44, %v415_v2  ;;  %v462_v27 = vmax.f32 %v434_v7, %v442_v16  ;;  %v463_v29 = vmax.f32 %v435_v8, %v443_v18 }
 0x142   :  { %v428_v10 = vadd.f32 %v420_v47, %v416_v3  ;;  %v429_v11 = vadd.f32 %v421_v48, %v417_v4  ;;  %v464_v31 = vmax.f32 %v436_v12, %v444_v22  ;;  %v465_v33 = vmax.f32 %v437_v9, %v445_v19 }
 0x143   :  { %v432_v13 = vpack.c.bf16 %v427_v6, %v426_v5  ;;  %v791_v47 = vand.u32 127, %v790_v41 }
 0x144   :  { %v433_v14 = vpack.c.bf16 %v429_v11, %v428_v10 }
 0x145   :  { %v438_v15 = vunpack.c.l.bf16 %v432_v13  ;;  %v439_v17 = vunpack.c.h.bf16 %v432_v13  ;;  %vm792_vm1 = vcmp.lt.s32.totalorder %v791_v47, 2 }
 0x146   :  { %v441_v20 = vunpack.c.h.bf16 %v433_v14  ;;  %v440_v21 = vunpack.c.l.bf16 %v433_v14 }
 0x147   :  { %v446_v23 = vmul.f32 0.20019531, %v438_v15  ;;  %v447_v24 = vmul.f32 0.20019531, %v439_v17 }
 0x148   :  { %v449_v25 = vmul.f32 0.20019531, %v441_v20  ;;  %v448_v26 = vmul.f32 0.20019531, %v440_v21 }
 0x149   :  { %v466_v28 = vmax.f32 %v438_v15, %v446_v23  ;;  %v467_v30 = vmax.f32 %v439_v17, %v447_v24 }
 0x14a   :  { %v468_v32 = vmax.f32 %v440_v21, %v448_v26  ;;  %v469_v34 = vmax.f32 %v441_v20, %v449_v25 }
 0x14b   :  { %v470_v35 = vpack.c.bf16 %v466_v28, %v462_v27  ;;  %v471_v36 = vpack.c.bf16 %v467_v30, %v463_v29 }
 0x14c   :  { %v472_v37 = vpack.c.bf16 %v468_v32, %v464_v31  ;;  %v473_v38 = vpack.c.bf16 %v469_v34, %v465_v33 }
 0x14d   :  { %742 = vmatmul.bf16.vlgmr.msrb.gmra.mxu1 %v470_v35  ;;  %756 = vmatmul.bf16.vlgmr.msrb.gmra.mxu2 %v471_v36 }
 0x14e   :  { %770 = vmatmul.bf16.vlgmr.msrb.gmra.mxu3 %v472_v37  ;;  %784 = vmatmul.bf16.vlgmr.msra.gmra.mxu0 %v473_v38 }
 0x1ca   :  { %v743_v39 = vpop.f32.mrf.mxu1 }
 0x1cb   :  { %v744_v42 = vadd.f32 %v1162_v40, %v743_v39  ;;  %v785_v46 = vpop.f32.mrf.mxu0 }
 0x1d0   :  { %v757_v43 = vpop.f32.mrf.mxu2 }
 0x1d1   :  { %v758_v44 = vadd.f32 %v757_v43, %v744_v42  ;;  %v771_v45 = vpop.f32.mrf.mxu3 }
 0x1d2   :  { %v745_v49 = vpop.f32.mrf.mxu1 }
 0x1d3   :  { %v772_v48 = vadd.f32 %v771_v45, %v758_v44  ;;  %v746_v52 = vadd.f32 %v1162_v40, %v745_v49  ;;  %v787_v59 = vpop.f32.mrf.mxu0 }
 0x1d5   :  { %v786_v50 = vadd.f32 %v785_v46, %v772_v48 }
 0x1d7   :  { %v793_v51 = vmul.f32 0.5, %v786_v50 }
 0x1d8   :  { %v759_v53 = vpop.f32.mrf.mxu2 }
 0x1d9   :  { %v795_v54 = vsel %vm792_vm1, 0.0, %v793_v51  ;;  %v760_v55 = vadd.f32 %v759_v53, %v746_v52  ;;  %v773_v57 = vpop.f32.mrf.mxu3 }
 0x1da   :  { %v797_v56 = vmul.f32 1.442695, %v795_v54 }
 0x1db   :  { %v774_v58 = vadd.f32 %v773_v57, %v760_v55 }
 0x1dc   :  { %1163 = vpow2.f32 %v797_v56 }
 0x1dd   :  { %v788_v60 = vadd.f32 %v787_v59, %v774_v58 }
 0x1df   :  { %v794_v61 = vmul.f32 0.5, %v788_v60 }
 0x1e1   :  { %v796_v62 = vsel %vm792_vm1, 0.0, %v794_v61 }
 0x1e2   :  { %v1164_v63 = vpop.eup %1163  ;;  %v799_v0 = vmul.f32 1.442695, %v796_v62 }
 0x1e3   :  { %v801_v1 = vsel %vm792_vm1, %v786_v50, %v1164_v63 }
 0x1e4   :  { %804 = vst.msk [vmem:[%s1583_s7] sm:$0xff] %vm803_vm2, %v801_v1  ;;  %1165 = vpow2.f32 %v799_v0 }
 0x1ea   :  { %v1166_v2 = vpop.eup %1165 }
 0x1eb   :  { %v802_v3 = vsel %vm792_vm1, %v788_v60, %v1166_v2 }
 0x1ec   :  { %805 = vst.msk [vmem:[%s1583_s7 + $0x8] sm:$0xff] %vm803_vm2, %v802_v3 }
 0x1ed   :  { %810 = vsyncpa [#allocation3], 1 }
 0x1ee   :  { %811 = vsyncpa [#allocation5], 1 }

</bundles_post_ra>
